<compile_context>
chip_gen: v7x
topology: tpu7x:2x2x1
jax: 0.10.0
libtpu: 0.0.40
codegen_flags: <defaults>
</compile_context>

<pallas_src>
import functools

import jax
import jax.numpy as jnp
from jax.experimental import pallas as pl
from jax.experimental.pallas import tpu as pltpu

# TODO(synk): nn.Dropout is identity at inference; training-mode dropout masks
# are not implemented in the kernel.


def _round_up(x: int, n: int) -> int:
    return ((x + n - 1) // n) * n


def _cdiv(a: int, b: int) -> int:
    return -(-a // b)


def _head_kernel(x_ref, w1_ref, b1_ref, w2_ref, b2_ref, o_ref, *, tanh_dtype):
    # In-kernel cast to the MXU compute dtype (avoids a wrapper-side f32->bf16
    # HBM round trip on the activations).
    x = x_ref[...].astype(w1_ref.dtype)
    # dense: (TM, Hp) @ (Hp, Hp) with f32 accumulation on the MXU.
    h = jnp.dot(x, w1_ref[...], preferred_element_type=jnp.float32)
    # Bias add in f32; tanh in tanh_dtype (bf16 on v6e/v7x halves the
    # intermediate's footprint; use f32 on v5e, which lacks bf16 VPU/EUP).
    h = jnp.tanh((h + b1_ref[...]).astype(tanh_dtype))
    # out_proj: (TM, Hp) @ (Hp, Lp) with f32 accumulation.
    out = jnp.dot(h.astype(w2_ref.dtype), w2_ref[...],
                  preferred_element_type=jnp.float32)
    out = out + b2_ref[...]
    # Lane-dense store: Lp is a multiple of 128.
    o_ref[...] = out.astype(o_ref.dtype)


def prepare_head_params(w1, b1, w2, b2, compute_dtype=jnp.bfloat16):
    """One-time (model-load) weight prep: cast to bf16 and pad to lane-dense
    128-multiples. Keeps per-call path free of weight pad/cast HBM traffic.

    w1: (hidden, hidden)      -- dense weight, already transposed (x @ w1)
    b1: (hidden,)
    w2: (hidden, num_labels)  -- out_proj weight, already transposed
    b2: (num_labels,)
    """
    hidden = w1.shape[0]
    num_labels = w2.shape[1]
    hp = _round_up(hidden, 128)
    lp = _round_up(num_labels, 128)

    w1p = jnp.pad(w1.astype(compute_dtype),
                  ((0, hp - hidden), (0, hp - hidden)))
    b1p = jnp.pad(b1.astype(jnp.float32), (0, hp - hidden)).reshape(1, hp)
    w2p = jnp.pad(w2.astype(compute_dtype),
                  ((0, hp - hidden), (0, lp - num_labels)))
    b2p = jnp.pad(b2.astype(jnp.float32), (0, lp - num_labels)).reshape(1, lp)
    return (w1p, b1p, w2p, b2p, hidden, num_labels)


@functools.partial(jax.jit, static_argnames=("num_labels", "tm", "tanh_dtype"))
def _model_head_jit(features, w1p, b1p, w2p, b2p, *, num_labels, tm,
                    tanh_dtype):
    batch, seq, hidden = features.shape
    hp = w1p.shape[0]
    lp = w2p.shape[1]
    m = batch * seq

    # Balanced M tiling: choose the number of tiles first, then the tile size,
    # so M is padded by at most one sublane row per tile. Force >= 2 grid
    # steps whenever m allows so both v7x TensorCores get work (harmless on
    # the single-TC v5e/v6e).
    num_tiles = max(_cdiv(m, tm), 2 if m > 8 else 1)
    tm_eff = _round_up(_cdiv(m, num_tiles), 8)
    num_tiles = _cdiv(m, tm_eff)
    mp = tm_eff * num_tiles

    # Activations stay in their native dtype; the bf16 cast is done in-kernel.
    # At real wav2vec2 sizes (hidden % 128 == 0, m % 8 == 0) this is a pure
    # reshape with no extra HBM traffic.
    x2d = features.reshape(m, hidden)
    if mp != m or hp != hidden:
        # Zero-padded hidden columns contribute nothing to either matmul;
        # padded rows / label columns are sliced off below.
        x2d = jnp.pad(x2d, ((0, mp - m), (0, hp - hidden)))

    x_item = jnp.dtype(features.dtype).itemsize
    w_item = jnp.dtype(w1p.dtype).itemsize
    o_item = jnp.dtype(features.dtype).itemsize
    tanh_item = jnp.dtype(tanh_dtype).itemsize

    # Deeper x buffering when the grid is long enough, to keep the per-step
    # f32 activation DMA hidden under the MXU on v6e.
    x_bufs = 3 if num_tiles >= 3 else 2
    x_spec_kwargs = {}
    if num_tiles >= 3:
        x_spec_kwargs["pipeline_mode"] = pl.Buffered(3)

    # Explicit VMEM budget (with headroom), capped below v7x's 64 MiB physical.
    vmem_bytes = (x_bufs * tm_eff * hp * x_item          # x pipeline buffers
                  + 2 * tm_eff * lp * o_item             # out pipeline buffers
                  + hp * hp * w_item + hp * lp * w_item  # resident weights
                  + 4 * (hp + lp)                        # biases (f32)
                  + tm_eff * hp * 4                      # f32 dense acc
                  + tm_eff * hp * tanh_item              # tanh intermediate
                  + tm_eff * lp * 4)                     # f32 out_proj acc
    vmem_limit = min(max(2 * vmem_bytes + (2 << 20), 32 << 20), 60 << 20)

    cost = pl.CostEstimate(
        flops=2 * mp * hp * (hp + lp),
        transcendentals=mp * hp,
        bytes_accessed=(mp * hp * x_item            # x (native dtype, once)
                        + hp * hp * w_item          # W1
                        + hp * lp * w_item          # W2
                        + 4 * (hp + lp)             # biases
                        + mp * lp * o_item),        # out
    )

    out2d = pl.pallas_call(
        functools.partial(_head_kernel, tanh_dtype=tanh_dtype),
        out_shape=jax.ShapeDtypeStruct((mp, lp), features.dtype),
        grid_spec=pl.GridSpec(
            grid=(num_tiles,),
            in_specs=[
                # x: tiled over M, pipelined by the grid.
                pl.BlockSpec((tm_eff, hp), lambda i: (i, 0), **x_spec_kwargs),
                # Weights / biases: constant index_map -> fetched once,
                # VMEM-resident across grid steps.
                pl.BlockSpec((hp, hp), lambda i: (0, 0)),
                pl.BlockSpec((1, hp), lambda i: (0, 0)),
                pl.BlockSpec((hp, lp), lambda i: (0, 0)),
                pl.BlockSpec((1, lp), lambda i: (0, 0)),
            ],
            out_specs=pl.BlockSpec((tm_eff, lp), lambda i: (i, 0)),
        ),
        compiler_params=pltpu.CompilerParams(
            # Independent M tiles -> shard grid steps across TCs on v7x.
            dimension_semantics=("parallel",),
            vmem_limit_bytes=int(vmem_limit),
        ),
        cost_estimate=cost,
    )(x2d, w1p, b1p, w2p, b2p)

    return out2d[:m, :num_labels].reshape(batch, seq, num_labels)


def model_head(features, head_params, *, tm=512, tanh_dtype=jnp.bfloat16):
    """features: (batch, seq, hidden) -> (batch, seq, num_labels) logits.

    head_params: output of prepare_head_params (padded bf16 weights + dims).
    tanh_dtype:  bf16 on v6e/v7x (bf16 VPU/EUP); pass jnp.float32 on v5e.
    """
    w1p, b1p, w2p, b2p, hidden, num_labels = head_params
    assert features.shape[-1] == hidden, "hidden mismatch vs prepared params"
    return _model_head_jit(features, w1p, b1p, w2p, b2p,
                           num_labels=num_labels, tm=tm, tanh_dtype=tanh_dtype)


def _reference_f32(features, w1, b1, w2, b2):
    h = jnp.tanh(features.astype(jnp.float32) @ w1.astype(jnp.float32) + b1)
    return h @ w2.astype(jnp.float32) + b2


if __name__ == "__main__":
    # Small shapes consistent with the module: hidden_size=32, num_labels=8.
    batch, seq, hidden, num_labels = 2, 8, 32, 8

    key = jax.random.PRNGKey(0)
    k_x, k_w1, k_b1, k_w2, k_b2 = jax.random.split(key, 5)

    features = jax.random.normal(k_x, (batch, seq, hidden), dtype=jnp.float32)
    # Deterministic parameter init (synthetic; no checkpoint load).
    w1 = jax.random.normal(k_w1, (hidden, hidden), dtype=jnp.float32) * 0.05
    b1 = jax.random.normal(k_b1, (hidden,), dtype=jnp.float32) * 0.01
    w2 = jax.random.normal(k_w2, (hidden, num_labels), dtype=jnp.float32) * 0.05
    b2 = jax.random.normal(k_b2, (num_labels,), dtype=jnp.float32) * 0.01

    # One-time weight prep (model-load time in a real pipeline).
    head_params = prepare_head_params(w1, b1, w2, b2)

    out = model_head(features, head_params)
    out = jax.block_until_ready(out)

    ref = _reference_f32(features, w1, b1, w2, b2)
    assert out.shape == (batch, seq, num_labels)
    # bf16 MXU inputs with f32 accumulation (and bf16 tanh) -> slightly looser
    # tolerance than the pure-f32 PyTorch path (documented divergence).
    assert jnp.allclose(out, ref, atol=2e-2, rtol=2e-2), "mismatch vs reference"

    # Dropout is identity at inference time (p applied only in training).
    print("KERNEL_OK")
</pallas_src>

<mosaic_0001>
module attributes {stable_mosaic.version = 11 : i64} {
  func.func @_head_kernel(%arg0: i32, %arg1: memref<8x128xf32, #tpu.memory_space<vmem>>, %arg2: memref<128x128xbf16, #tpu.memory_space<vmem>>, %arg3: memref<1x128xf32, #tpu.memory_space<vmem>>, %arg4: memref<128x128xbf16, #tpu.memory_space<vmem>>, %arg5: memref<1x128xf32, #tpu.memory_space<vmem>>, %arg6: memref<8x128xf32, #tpu.memory_space<vmem>>) attributes {dimension_semantics = [#tpu.dimension_semantics<parallel>], iteration_bounds = array<i64: 2>, scalar_prefetch = 0 : i64, scratch_operands = 0 : i64, tpu.core_type = #tpu.core_type<tc>, window_params = [{transform_indices = @transform_0, window_bounds = array<i64: 8, 128>}, {pipeline_mode = #tpu.pipeline_mode<synchronous>, transform_indices = @transform_1, window_bounds = array<i64: 128, 128>}, {pipeline_mode = #tpu.pipeline_mode<synchronous>, transform_indices = @transform_2, window_bounds = array<i64: 1, 128>}, {pipeline_mode = #tpu.pipeline_mode<synchronous>, transform_indices = @transform_3, window_bounds = array<i64: 128, 128>}, {pipeline_mode = #tpu.pipeline_mode<synchronous>, transform_indices = @transform_4, window_bounds = array<i64: 1, 128>}, {transform_indices = @transform_5, window_bounds = array<i64: 8, 128>}]} {
    %c0 = arith.constant 0 : index
    %c0_0 = arith.constant 0 : index
    %0 = vector.load %arg1[%c0, %c0_0] : memref<8x128xf32, #tpu.memory_space<vmem>>, vector<8x128xf32>
    %1 = arith.truncf %0 : vector<8x128xf32> to vector<8x128xbf16>
    %c0_1 = arith.constant 0 : index
    %c0_2 = arith.constant 0 : index
    %2 = vector.load %arg2[%c0_1, %c0_2] : memref<128x128xbf16, #tpu.memory_space<vmem>>, vector<128x128xbf16>
    %cst = arith.constant dense<0.000000e+00> : vector<8x128xf32>
    %3 = tpu.matmul %1, %2, %cst {dimension_numbers = #tpu.dot_dimension_numbers<[1], [0], [0], [1], [0, 0, 1, 1], [], []>} : vector<8x128xbf16>, vector<128x128xbf16>, vector<8x128xf32> -> vector<8x128xf32>
    %c0_3 = arith.constant 0 : index
    %c0_4 = arith.constant 0 : index
    %4 = vector.load %arg3[%c0_3, %c0_4] : memref<1x128xf32, #tpu.memory_space<vmem>>, vector<1x128xf32>
    %5 = vector.broadcast %4 : vector<1x128xf32> to vector<8x128xf32>
    %6 = arith.addf %3, %5 : vector<8x128xf32>
    %7 = arith.truncf %6 : vector<8x128xf32> to vector<8x128xbf16>
    %8 = math.tanh %7 : vector<8x128xbf16>
    %c0_5 = arith.constant 0 : index
    %c0_6 = arith.constant 0 : index
    %9 = vector.load %arg4[%c0_5, %c0_6] : memref<128x128xbf16, #tpu.memory_space<vmem>>, vector<128x128xbf16>
    %cst_7 = arith.constant dense<0.000000e+00> : vector<8x128xf32>
    %10 = tpu.matmul %8, %9, %cst_7 {dimension_numbers = #tpu.dot_dimension_numbers<[1], [0], [0], [1], [0, 0, 1, 1], [], []>} : vector<8x128xbf16>, vector<128x128xbf16>, vector<8x128xf32> -> vector<8x128xf32>
    %c0_8 = arith.constant 0 : index
    %c0_9 = arith.constant 0 : index
    %11 = vector.load %arg5[%c0_8, %c0_9] : memref<1x128xf32, #tpu.memory_space<vmem>>, vector<1x128xf32>
    %12 = vector.broadcast %11 : vector<1x128xf32> to vector<8x128xf32>
    %13 = arith.addf %10, %12 : vector<8x128xf32>
    %c0_10 = arith.constant 0 : index
    %c0_11 = arith.constant 0 : index
    %14 = vector.load %arg6[%c0_10, %c0_11] : memref<8x128xf32, #tpu.memory_space<vmem>>, vector<8x128xf32>
    tpu.vector_store %arg6[%c0_10, %c0_11], %13 {strides = array<i32>} : memref<8x128xf32, #tpu.memory_space<vmem>>, vector<8x128xf32>,
    return
  }
  func.func @transform_0(%arg0: i32) -> (i32, i32) {
    %c0_i32 = arith.constant 0 : i32
    %c0_i32_0 = arith.constant 0 : i32
    return %arg0, %c0_i32 : i32, i32
  }
  func.func @transform_1(%arg0: i32) -> (i32, i32) {
    %c0_i32 = arith.constant 0 : i32
    %c0_i32_0 = arith.constant 0 : i32
    %c0_i32_1 = arith.constant 0 : i32
    return %c0_i32, %c0_i32_0 : i32, i32
  }
  func.func @transform_2(%arg0: i32) -> (i32, i32) {
    %c0_i32 = arith.constant 0 : i32
    %c0_i32_0 = arith.constant 0 : i32
    %c0_i32_1 = arith.constant 0 : i32
    return %c0_i32, %c0_i32_0 : i32, i32
  }
  func.func @transform_3(%arg0: i32) -> (i32, i32) {
    %c0_i32 = arith.constant 0 : i32
    %c0_i32_0 = arith.constant 0 : i32
    %c0_i32_1 = arith.constant 0 : i32
    return %c0_i32, %c0_i32_0 : i32, i32
  }
  func.func @transform_4(%arg0: i32) -> (i32, i32) {
    %c0_i32 = arith.constant 0 : i32
    %c0_i32_0 = arith.constant 0 : i32
    %c0_i32_1 = arith.constant 0 : i32
    return %c0_i32, %c0_i32_0 : i32, i32
  }
  func.func @transform_5(%arg0: i32) -> (i32, i32) {
    %c0_i32 = arith.constant 0 : i32
    %c0_i32_0 = arith.constant 0 : i32
    return %arg0, %c0_i32 : i32, i32
  }
}

</mosaic_0001>

<bundles_post_ra>
// kernel: _model_head_jit.1
= control target key start
LH: loop header
LB: loop body
LE: loop exit
PB: predicated region body
PF: predicated region fallthrough
CT: control target
= control target key end

     0   :  { %10 = vsyncpa [#allocation3], 0  ;;  %s907_s0 = inlined_call_operand.vmem [shape: f32[16,128], index: 0, kind: input, shape index: {}]   ;;  %s908_s1 = inlined_call_operand.hbm [shape: bf16[128,128], index: 1, kind: input, shape index: {}]   ;;  %s909_s2 = inlined_call_operand.vmem [shape: f32[1,128], index: 2, kind: input, shape index: {}]   ;;  %s910_s3 = inlined_call_operand.hbm [shape: bf16[128,128], index: 3, kind: input, shape index: {}]   ;;  %s911_s4 = inlined_call_operand.vmem [shape: f32[1,128], index: 4, kind: input, shape index: {}]   ;;  %s912_s5 = inlined_call_operand.vmem [shape: f32[16,128], index: 5, kind: output, shape index: {}]  }
   0x1   :  { %11 = vsyncpa [#allocation5], 0  ;;  %s801_s18 = smov 0  }
   0x2 LB: > { %s807_s19 = sadd.s32 4294967295, %s763_s18   ;;  %p555_p0 = scmp.ge.s32.totalorder %s763_s18, 1  ;;  %s763_s18 = sphi %s801_s18, %s17_s18  }
   0x3   : > { %p158_p1 = scmp.lt.s32.totalorder %s763_s18, 3  ;;  %s765_s20 = smov [#allocation2]  }
   0x4   : > { %s170_s21 = sshll.u32 %s765_s20, 4  ;;  %p913_p3 = scmp.eq.s32.totalorder %s807_s19, 0  ;;  %s171_s21 = int_to_ptr.vmem [resolvable:$true] %s170_s21 }
   0x5   : > { %p811_p2 = pnand %p555_p0, %p158_p1  ;;  %s766_s23 = smov [#allocation4]  }
   0x6   : > { %s186_s24 = sshll.u32 %s766_s23, 4  ;;  %s693_s28 = scalar_lea.hbm %s908_s1, 1024  ;;  %s824_s24 = int_to_ptr.vmem [resolvable:$true] %s186_s24 }
   0x7   : > { %s915_s22 = scalar_select %p811_p2, 1, 0 }
   0x8   : > { %p650_p4 = pneg %p811_p2  ;;  %p694_p6 = scmp.ne.s32.totalorder %s908_s1, %s693_s28 }
   0x9   : > { %p700_p10 = scmp.lt.u32.totalorder %s693_s28, %s908_s1 }
   0xa   : > { %p820_p5 = pnand %p913_p3, %p650_p4 }
   0xc   : > { %p695_p7 = pneg %p820_p5 }
   0xe   : > { %p696_p8 = pnand %p695_p7, %p694_p6 }
  0x10   : > { %p697_p9 = pneg %p696_p8 }
  0x12   : > { %p702_p11 = pnand %p700_p10, %p697_p9 }
  0x14   : > { %705 = shalt.err (!%p702_p11)
}
  0x15   : > { %s706_s8 = scalar_lea.vmem %s171_s21, 1024  ;;  %p714_p1 = scmp.lt.s32.totalorder %s171_s21, %s171_s21 }
  0x16   : > { %p707_p12 = scmp.ne.s32.totalorder %s171_s21, %s706_s8  ;;  %p715_p4 = scmp.lt.s32.totalorder %s706_s8, %s706_s8 }
  0x18   : > { %p709_p13 = pnand %p707_p12, %p695_p7  ;;  %p716_p3 = por %p715_p4, %p714_p1 }
  0x1a   : > { %p710_p0 = pneg %p709_p13 }
  0x1c   : > { %p717_p2 = pnand %p716_p3, %p710_p0 }
  0x1e   : > { %720 = shalt.err (!%p717_p2)
}
  0x1f   : > { %s767_s9 = smov 64   ;;  %s768_s10 = smov 4  }
  0x20   : > { %653 = dma.hbm_to_vmem [thread:$0]  (!%p820_p5), %s908_s1, 1024, %s171_s21, [#allocation3], %s767_s9, %s767_s9, %s768_s10  }
  0x21   : > { %s721_s15 = scalar_lea.hbm %s910_s3, 1024 }
  0x22   : > { %p722_p6 = scmp.ne.s32.totalorder %s910_s3, %s721_s15  ;;  %p728_p8 = scmp.lt.u32.totalorder %s721_s15, %s910_s3 }
  0x24   : > { %p724_p2 = pnand %p722_p6, %p695_p7 }
  0x26   : > { %p725_p3 = pneg %p724_p2 }
  0x28   : > { %p730_p9 = pnand %p728_p8, %p725_p3 }
  0x2a   : > { %733 = shalt.err (!%p730_p9)
}
  0x2b   : > { %s734_s21 = scalar_lea.vmem %s824_s24, 1024  ;;  %p742_p13 = scmp.lt.s32.totalorder %s824_s24, %s824_s24 }
  0x2c   : > { %p735_p10 = scmp.ne.s32.totalorder %s824_s24, %s734_s21  ;;  %p743_p0 = scmp.lt.s32.totalorder %s734_s21, %s734_s21 }
  0x2e   : > { %p737_p11 = pnand %p735_p10, %p695_p7  ;;  %p744_p1 = por %p743_p0, %p742_p13 }
  0x30   : > { %p738_p12 = pneg %p737_p11 }
  0x32   : > { %p745_p4 = pnand %p744_p1, %p738_p12 }
  0x34   : > { %748 = shalt.err (!%p745_p4)
}
  0x35   : > { %656 = dma.hbm_to_vmem [thread:$0]  (!%p820_p5), %s910_s3, 1024, %s824_s24, [#allocation5], %s767_s9, %s767_s9, %s768_s10  }
  0x36   : > { %p917_p6 = scmp.ne.s32.totalorder %s915_s22, 0 }
  0x37   : > { %p918_p2 = scmp.eq.s32.totalorder (!%p917_p6), %s807_s19, 0 }
  0x38   : > { %212 = sbr.rel (%p917_p6) target bundleno = 544 (0x220), region = 40 }
  0x3f   : > { %754 = dma.done.wait (%p918_p2), [#allocation3], 1024   ;;  %p919_p7 = pmov %p918_p2 }
  0x40   : > { %p920_p3 = pmov %p918_p2 }
  0x41   : > { %756 = vsyncadd (%p919_p7), [#allocation3], 4294966272 }
  0x42   : > { %758 = dma.done.wait (%p920_p3), [#allocation5], 1024   ;;  %p921_p8 = pmov %p918_p2 }
  0x43   : > { %v769_v0 = vmov 0.0   ;;  %vm770_vm0 = vmmov 0   ;;  %v675_v1 = vld [vmem:[#allocation2] sm:$0xff]   ;;  %v676_v2 = vld [vmem:[#allocation2 + $0x8] sm:$0xff]   ;;  %v677_v3 = vld [vmem:[#allocation2 + $0x10] sm:$0xff]   ;;  %p242_p5 = scmp.lt.s32.totalorder %s807_s19, 1 }
  0x44   : > { %760 = vsyncadd (%p921_p8), [#allocation5], 4294966272  ;;  %602 = vmatprep.subr.bf16.mxu0 %v769_v0  ;;  %618 = vmatprep.mubr.msk.bf16.mxu0 %vm770_vm0, %v769_v0  ;;  %v683_v4 = vld [vmem:[#allocation4] sm:$0xff]   ;;  %v678_v5 = vld [vmem:[#allocation2 + $0x18] sm:$0xff]  }
  0x45   : > { %622 = vmatprep.subr.bf16.mxu1 %v769_v0  ;;  %638 = vmatprep.mubr.msk.bf16.mxu1 %vm770_vm0, %v769_v0  ;;  %v684_v6 = vld [vmem:[#allocation4 + $0x8] sm:$0xff]   ;;  %v679_v7 = vld [vmem:[#allocation2 + $0x20] sm:$0xff]   ;;  %v685_v8 = vld [vmem:[#allocation4 + $0x10] sm:$0xff]   ;;  %s923_s19 = smov (!%p242_p5, %s807_s19), 1 }
  0x46   : > { %603 = vmatpush3.bf16.msra.mxu0 %v675_v1  ;;  %623 = vmatpush3.bf16.msra.mxu1 %v683_v4  ;;  %v680_v9 = vld [vmem:[#allocation2 + $0x28] sm:$0xff]   ;;  %v686_v10 = vld [vmem:[#allocation4 + $0x18] sm:$0xff]   ;;  %s562_s22 = sshll.u32 %s923_s19, 3  ;;  %v681_v11 = vld [vmem:[#allocation2 + $0x30] sm:$0xff]  }
  0x47   : > { %604 = vmatprep.subr.bf16.mxu0 %v769_v0  ;;  %624 = vmatprep.subr.bf16.mxu1 %v769_v0  ;;  %s245_s28 = scalar_lea.vmem %s907_s0, %s562_s22  ;;  %v682_v12 = vld [vmem:[#allocation2 + $0x38] sm:$0xff]   ;;  %v687_v15 = vld [vmem:[#allocation4 + $0x20] sm:$0xff]   ;;  %v688_v16 = vld [vmem:[#allocation4 + $0x28] sm:$0xff]   ;;  %s249_s10 = scalar_lea.vmem %s912_s5, %s562_s22 }
  0x48   : > { %v251_v13 = vld [vmem:[%s245_s28] sm:$0xff]  ;;  %v689_v17 = vld [vmem:[#allocation4 + $0x30] sm:$0xff]   ;;  %v690_v18 = vld [vmem:[#allocation4 + $0x38] sm:$0xff]  }
  0x49   : > { %v252_v14 = vpack.c.bf16 %v251_v13, %v251_v13  ;;  %v564_v19 = vld [vmem:[%s909_s2] ss:$0 sm:$0xff] }
  0x4a   : > { %605 = vmatpush3.bf16.msra.mxu0 %v676_v2  ;;  %625 = vmatpush3.bf16.msra.mxu1 %v684_v6  ;;  %v573_v27 = vld [vmem:[%s911_s4] ss:$0 sm:$0xff] }
  0x4b   : > { %606 = vmatprep.subr.bf16.mxu0 %v769_v0  ;;  %626 = vmatprep.subr.bf16.mxu1 %v769_v0 }
  0x4e   : > { %607 = vmatpush3.bf16.msra.mxu0 %v677_v3  ;;  %627 = vmatpush3.bf16.msra.mxu1 %v685_v8 }
  0x4f   : > { %608 = vmatprep.subr.bf16.mxu0 %v769_v0  ;;  %628 = vmatprep.subr.bf16.mxu1 %v769_v0 }
  0x52   : > { %609 = vmatpush3.bf16.msra.mxu0 %v678_v5  ;;  %629 = vmatpush3.bf16.msra.mxu1 %v686_v10 }
  0x53   : > { %610 = vmatprep.subr.bf16.mxu0 %v769_v0  ;;  %630 = vmatprep.subr.bf16.mxu1 %v769_v0 }
  0x56   : > { %611 = vmatpush3.bf16.msra.mxu0 %v679_v7  ;;  %631 = vmatpush3.bf16.msra.mxu1 %v687_v15 }
  0x57   : > { %612 = vmatprep.subr.bf16.mxu0 %v769_v0  ;;  %632 = vmatprep.subr.bf16.mxu1 %v769_v0 }
  0x5a   : > { %613 = vmatpush3.bf16.msra.mxu0 %v680_v9  ;;  %633 = vmatpush3.bf16.msra.mxu1 %v688_v16 }
  0x5b   : > { %614 = vmatprep.subr.bf16.mxu0 %v769_v0  ;;  %634 = vmatprep.subr.bf16.mxu1 %v769_v0 }
  0x5e   : > { %615 = vmatpush3.bf16.msra.mxu0 %v681_v11  ;;  %635 = vmatpush3.bf16.msra.mxu1 %v689_v17 }
  0x5f   : > { %616 = vmatprep.subr.bf16.mxu0 %v769_v0  ;;  %636 = vmatprep.subr.bf16.mxu1 %v769_v0 }
  0x62   : > { %617 = vmatpush3.bf16.msra.mxu0 %v682_v12  ;;  %637 = vmatpush3.bf16.msra.mxu1 %v690_v18 }
  0x65   : > { %619 = vmatmul.mubr.bf16.vlgmr.msra.gmra.mrb[0].mxu0 %v252_v14 }
 0x138   : > { %v358_v20 = vpop.f32.mrb[0].mxu0 }
 0x139   : > { %v359_v21 = vadd.f32 %v564_v19, %v358_v20  ;;  %v620_v22 = vpop.f32.mrb[1].mxu0 }
 0x13a   : > { %v361_v23 = vpop.f32.mrb[2].mxu0 }
 0x13b   : > { %v364_v24 = vpack.c.bf16 %v359_v21, %v359_v21  ;;  %v621_v25 = vpop.f32.mrb[3].mxu0 }
 0x13d   : > { %691 = vtanh.bf16 %v364_v24 }
 0x148   : > { %v692_v26 = vpop.eup %691 }
 0x149   : > { %639 = vmatmul.mubr.bf16.vlgmr.msra.gmra.mrb[0].mxu1 %v692_v26 }
 0x21c   : > { %v471_v28 = vpop.f32.mrb[0].mxu1 }
 0x21d   : > { %v472_v29 = vadd.f32 %v573_v27, %v471_v28  ;;  %v640_v30 = vpop.f32.mrb[1].mxu1 }
 0x21e   : > { %v474_v31 = vpop.f32.mrb[2].mxu1 }
 0x21f   : > { %477 = vst [vmem:[%s249_s10] sm:$0xff] %v472_v29  ;;  %v641_v32 = vpop.f32.mrb[3].mxu1 }
 0x220 PF: > { %s17_s18 = sadd.s32 1, %s763_s18  }
 0x221   : > { %p14_p9 = scmp.ge.s32.totalorder %s17_s18, 4  }
 0x223   :  { %16 = sbr.rel (!%p14_p9) target bundleno = 2 (0x2), region = 79 }
 0x22a   :  { %497 = vsyncpa [#allocation3], 1 }
 0x22b   :  { %499 = vsyncpa [#allocation3 + $0x1], 1 }
 0x22c   :  { %500 = vsyncpa [#allocation5], 1 }

</bundles_post_ra>
